<compile_context>
chip_gen: v7x
topology: tpu7x:2x2x1
jax: 0.10.0
libtpu: 0.0.40
codegen_flags: <defaults>
</compile_context>

<pallas_src>
import functools

import jax
import jax.numpy as jnp
from jax import lax
from jax.experimental import pallas as pl
from jax.experimental.pallas import tpu as pltpu

_EPS = 1e-8  # nn.CosineSimilarity default eps


def _row_sq_norms(x):
    """Per-row squared L2 norms in f32, shape (rows, 1)."""
    x32 = x.astype(jnp.float32)
    return jnp.sum(x32 * x32, axis=1, keepdims=True)


def _pair_dots(a, b):
    """(tb, D) x (n_pad, D) -> (tb, n_pad) on the MXU, contracting the feature axis."""
    return lax.dot_general(
        a, b, (((1,), (1,)), ((), ())), preferred_element_type=jnp.float32)


def _diversity_kernel(layer_ref, noise_ref, lsq_col_ref, nsq_col_ref, out_ref,
                      *, metric, n_valid, tb):
    i = pl.program_id(0)
    row0 = pl.multiple_of(i * tb, tb)
    n_pad = layer_ref.shape[0]
    d_layer = layer_ref.shape[1]
    d_noise = noise_ref.shape[1]

    # Row tile (LHS) and full resident row set (RHS) in their native dtype (MXU operands).
    li = layer_ref[pl.ds(row0, tb), :]      # (tb, Dl)
    ni = noise_ref[pl.ds(row0, tb), :]      # (tb, Dn)
    la = layer_ref[...]                     # (n_pad, Dl)
    na = noise_ref[...]                     # (n_pad, Dn)

    # Noise pairwise distance (always l2), via the MXU:
    #   mean_d (a_d - b_d)^2 = (||a||^2 + ||b||^2 - 2 a.b) / Dn
    nsq_i = _row_sq_norms(ni)                                          # (tb, 1)
    dots_n = _pair_dots(ni, na)                                        # (tb, n_pad)
    noise_dist = jnp.maximum(nsq_i + nsq_col_ref[...] - 2.0 * dots_n, 0.0) * (1.0 / d_noise)

    if metric == "l1":
        # l1 has no matmul identity; keep a bounded VPU broadcast (tb=8 rows per step).
        # For very large N*Dl this branch would additionally need column/feature tiling.
        diff = jnp.abs(li.astype(jnp.float32)[:, None, :] -
                       la.astype(jnp.float32)[None, :, :])             # (tb, n_pad, Dl)
        layer_dist = jnp.sum(diff, axis=2) * (1.0 / d_layer)
    elif metric == "l2":
        lsq_i = _row_sq_norms(li)
        dots_l = _pair_dots(li, la)
        layer_dist = jnp.maximum(lsq_i + lsq_col_ref[...] - 2.0 * dots_l, 0.0) * (1.0 / d_layer)
    elif metric == "cosine":
        lsq_i = _row_sq_norms(li)
        dots_l = _pair_dots(li, la)
        # single sqrt of the product + EUP reciprocal (approx=True costs ~1e-4 rel. error)
        norm_prod = jnp.sqrt(lsq_i * lsq_col_ref[...])                 # (tb, n_pad)
        layer_dist = 1.0 - dots_l * pl.reciprocal(jnp.maximum(norm_prod, _EPS), approx=True)
    else:
        raise ValueError(metric)

    prod = noise_dist * layer_dist                                     # (tb, n_pad)

    if n_pad != n_valid:
        # Only needed when the batch was zero-padded; cheap (tb,1)/(1,n_pad) iotas.
        rows_ok = (row0 + lax.broadcasted_iota(jnp.int32, (tb, 1), 0)) < n_valid
        cols_ok = lax.broadcasted_iota(jnp.int32, (1, n_pad), 1) < n_valid
        prod = jnp.where(rows_ok & cols_ok, prod, 0.0)

    # Per-row partial sums for this row tile; final reduce + exp happen in the wrapper.
    out_ref[...] = jnp.sum(prod, axis=1, keepdims=True)                # (tb, 1)


def diversity_loss(noises, layer, metric, *, max_rows_per_step=128):
    """Pallas equivalent of DiversityLoss(metric)(noises, layer)."""
    if metric not in ("l1", "l2", "cosine"):
        raise ValueError(metric)
    if layer.ndim > 2:
        layer = layer.reshape(layer.shape[0], -1)
    n = layer.shape[0]
    if noises.ndim != 2 or noises.shape[0] != n:
        raise ValueError("noises must be 2-D and share the batch dimension with layer")

    # Row tile: large for the MXU (l2/cosine) paths, small for the VPU-bound l1 path.
    n_pad8 = pl.cdiv(n, 8) * 8
    if metric == "l1":
        max_tb = 8
    else:
        max_tb = max(8, (int(max_rows_per_step) // 8) * 8)
    tb = min(max_tb, n_pad8)
    n_pad = pl.cdiv(n, tb) * tb

    if n_pad != n:  # zero-pad rows; padded pairs are masked inside the kernel
        layer = jnp.pad(layer, ((0, n_pad - n), (0, 0)))
        noises = jnp.pad(noises, ((0, n_pad - n), (0, 0)))

    d_layer = layer.shape[1]
    d_noise = noises.shape[1]

    # Hoisted once: column-side squared norms in f32, lane-dense (1, n_pad).
    lsq_col = jnp.sum(jnp.square(layer.astype(jnp.float32)), axis=1)[None, :]
    nsq_col = jnp.sum(jnp.square(noises.astype(jnp.float32)), axis=1)[None, :]

    kernel = functools.partial(_diversity_kernel, metric=metric, n_valid=n, tb=tb)
    partials = pl.pallas_call(
        kernel,
        out_shape=jax.ShapeDtypeStruct((n_pad, 1), jnp.float32),
        grid_spec=pltpu.PrefetchScalarGridSpec(
            num_scalar_prefetch=0,
            grid=(n_pad // tb,),
            in_specs=[
                pl.BlockSpec((n_pad, d_layer), lambda i: (0, 0)),   # resident rows
                pl.BlockSpec((n_pad, d_noise), lambda i: (0, 0)),   # resident rows
                pl.BlockSpec((1, n_pad), lambda i: (0, 0)),         # layer col sq-norms
                pl.BlockSpec((1, n_pad), lambda i: (0, 0)),         # noise col sq-norms
            ],
            out_specs=pl.BlockSpec((tb, 1), lambda i: (i, 0)),      # per-row partials
        ),
        compiler_params=pltpu.CompilerParams(
            dimension_semantics=("parallel",),                      # both TCs on v7x
            vmem_limit_bytes=64 * 1024 * 1024,
        ),
    )(layer, noises, lsq_col, nsq_col)

    total = jnp.sum(partials)               # padded rows contribute exactly 0
    return jnp.exp(-total / (n * n))


def _pairwise_distance_ref(x, metric):
    """Plain-JAX mirror of DiversityLoss.pairwise_distance."""
    t1 = x[None, :, :]   # tensor1[i, j] = x[j]
    t2 = x[:, None, :]   # tensor2[i, j] = x[i]
    if metric == "l1":
        return jnp.mean(jnp.abs(t1 - t2), axis=2)
    if metric == "l2":
        return jnp.mean((t1 - t2) ** 2, axis=2)
    if metric == "cosine":
        dots = jnp.sum(t1 * t2, axis=2)
        norms = jnp.sqrt(jnp.sum(x * x, axis=1))
        norm_prod = norms[None, :] * norms[:, None]
        return 1.0 - dots / jnp.maximum(norm_prod, _EPS)
    raise ValueError(metric)


def _reference(noises, layer, metric):
    """Plain-JAX mirror of DiversityLoss.forward."""
    if layer.ndim > 2:
        layer = layer.reshape(layer.shape[0], -1)
    layer_dist = _pairwise_distance_ref(layer, metric)
    noise_dist = _pairwise_distance_ref(noises, "l2")
    return jnp.exp(jnp.mean(-noise_dist * layer_dist))


if __name__ == "__main__":
    key = jax.random.PRNGKey(0)
    k1, k2, k3, k4, k5, k6 = jax.random.split(key, 6)

    dn = 10          # noise dimension
    c, h = 4, 8      # layer channels x spatial -> flattened feature dim 32

    # Case 1: batch divisible by 8 (single row tile for the MXU metrics).
    n1 = 16
    noises1 = jax.random.normal(k1, (n1, dn), dtype=jnp.float32)
    layer1 = jax.random.normal(k2, (n1, c, h), dtype=jnp.float32)   # rank > 2, flattened

    # Case 2: ragged batch (exercises zero-padding + masking).
    n2 = 13
    noises2 = jax.random.normal(k3, (n2, dn), dtype=jnp.float32)
    layer2 = jax.random.normal(k4, (n2, c * h), dtype=jnp.float32)

    # Case 3: multiple row tiles on the parallel grid axis (small max tile) + padding.
    n3 = 40
    noises3 = jax.random.normal(k5, (n3, dn), dtype=jnp.float32)
    layer3 = jax.random.normal(k6, (n3, c * h), dtype=jnp.float32)

    ok = True
    cases = [(noises1, layer1, 128), (noises2, layer2, 128), (noises3, layer3, 16)]
    for noises, layer, max_tb in cases:
        for metric in ("l1", "l2", "cosine"):
            got = jax.block_until_ready(
                diversity_loss(noises, layer, metric, max_rows_per_step=max_tb))
            want = _reference(noises, layer, metric)
            # Tolerance covers MXU accumulation-order / multi-pass fp32 differences and
            # the approximate EUP reciprocal used in the cosine path.
            if not jnp.allclose(got, want, rtol=5e-3, atol=1e-6):
                ok = False
                print(f"MISMATCH metric={metric} n={noises.shape[0]} got={got} want={want}")

    if ok:
        print("KERNEL_OK")
</pallas_src>

<mosaic_0001>
module attributes {stable_mosaic.version = 11 : i64} {
  func.func @_diversity_kernel(%arg0: i32, %arg1: memref<16x32xf32, #tpu.memory_space<vmem>>, %arg2: memref<16x10xf32, #tpu.memory_space<vmem>>, %arg3: memref<1x16xf32, #tpu.memory_space<vmem>>, %arg4: memref<1x16xf32, #tpu.memory_space<vmem>>, %arg5: memref<8x1xf32, #tpu.memory_space<vmem>>) attributes {dimension_semantics = [#tpu.dimension_semantics<parallel>], iteration_bounds = array<i64: 2>, scalar_prefetch = 0 : i64, scratch_operands = 0 : i64, tpu.core_type = #tpu.core_type<tc>, window_params = [{pipeline_mode = #tpu.pipeline_mode<synchronous>, transform_indices = @transform_0, window_bounds = array<i64: 16, 32>}, {pipeline_mode = #tpu.pipeline_mode<synchronous>, transform_indices = @transform_1, window_bounds = array<i64: 16, 10>}, {pipeline_mode = #tpu.pipeline_mode<synchronous>, transform_indices = @transform_2, window_bounds = array<i64: 1, 16>}, {pipeline_mode = #tpu.pipeline_mode<synchronous>, transform_indices = @transform_3, window_bounds = array<i64: 1, 16>}, {transform_indices = @transform_4, window_bounds = array<i64: 8, 1>}]} {
    %c8_i32 = arith.constant 8 : i32
    %0 = arith.muli %arg0, %c8_i32 : i32
    %1 = tpu.assume_multiple %0, 8 : i32
    %2 = arith.index_cast %1 : i32 to index
    %c0 = arith.constant 0 : index
    %3 = vector.load %arg1[%2, %c0] : memref<16x32xf32, #tpu.memory_space<vmem>>, vector<8x32xf32>
    %4 = arith.index_cast %1 : i32 to index
    %c0_0 = arith.constant 0 : index
    %5 = vector.load %arg2[%4, %c0_0] : memref<16x10xf32, #tpu.memory_space<vmem>>, vector<8x10xf32>
    %c0_1 = arith.constant 0 : index
    %c0_2 = arith.constant 0 : index
    %6 = vector.load %arg1[%c0_1, %c0_2] : memref<16x32xf32, #tpu.memory_space<vmem>>, vector<16x32xf32>
    %c0_3 = arith.constant 0 : index
    %c0_4 = arith.constant 0 : index
    %7 = vector.load %arg2[%c0_3, %c0_4] : memref<16x10xf32, #tpu.memory_space<vmem>>, vector<16x10xf32>
    %8 = arith.mulf %5, %5 : vector<8x10xf32>
    %cst = arith.constant dense<0.000000e+00> : vector<8xf32>
    %9 = vector.multi_reduction <add>, %8, %cst [1] : vector<8x10xf32> to vector<8xf32>
    %10 = vector.shape_cast %9 : vector<8xf32> to vector<8x1xf32>
    %cst_5 = arith.constant dense<0.000000e+00> : vector<8x16xf32>
    %11 = tpu.matmul %5, %7, %cst_5 {dimension_numbers = #tpu.dot_dimension_numbers<[1], [1], [0], [0], [0, 0, 1, 0], [], []>} : vector<8x10xf32>, vector<16x10xf32>, vector<8x16xf32> -> vector<8x16xf32>
    %c0_6 = arith.constant 0 : index
    %c0_7 = arith.constant 0 : index
    %12 = vector.load %arg4[%c0_6, %c0_7] : memref<1x16xf32, #tpu.memory_space<vmem>>, vector<1x16xf32>
    %13 = vector.broadcast %10 : vector<8x1xf32> to vector<8x16xf32>
    %14 = vector.broadcast %12 : vector<1x16xf32> to vector<8x16xf32>
    %15 = arith.addf %13, %14 : vector<8x16xf32>
    %cst_8 = arith.constant 2.000000e+00 : f32
    %16 = vector.broadcast %cst_8 : f32 to vector<8x16xf32>
    %17 = arith.mulf %16, %11 : vector<8x16xf32>
    %18 = arith.subf %15, %17 : vector<8x16xf32>
    %cst_9 = arith.constant 0.000000e+00 : f32
    %19 = vector.broadcast %cst_9 : f32 to vector<8x16xf32>
    %20 = arith.maximumf %18, %19 : vector<8x16xf32>
    %cst_10 = arith.constant 1.000000e-01 : f32
    %21 = vector.broadcast %cst_10 : f32 to vector<8x16xf32>
    %22 = arith.mulf %20, %21 : vector<8x16xf32>
    %23 = vector.shape_cast %3 : vector<8x32xf32> to vector<8x1x32xf32>
    %24 = vector.shape_cast %6 : vector<16x32xf32> to vector<1x16x32xf32>
    %25 = vector.broadcast %23 : vector<8x1x32xf32> to vector<8x16x32xf32>
    %26 = vector.broadcast %24 : vector<1x16x32xf32> to vector<8x16x32xf32>
    %27 = arith.subf %25, %26 : vector<8x16x32xf32>
    %28 = math.absf %27 : vector<8x16x32xf32>
    %cst_11 = arith.constant dense<0.000000e+00> : vector<8x16xf32>
    %29 = vector.multi_reduction <add>, %28, %cst_11 [2] : vector<8x16x32xf32> to vector<8x16xf32>
    %cst_12 = arith.constant 3.125000e-02 : f32
    %30 = vector.broadcast %cst_12 : f32 to vector<8x16xf32>
    %31 = arith.mulf %29, %30 : vector<8x16xf32>
    %32 = arith.mulf %22, %31 : vector<8x16xf32>
    %cst_13 = arith.constant dense<0.000000e+00> : vector<8xf32>
    %33 = vector.multi_reduction <add>, %32, %cst_13 [1] : vector<8x16xf32> to vector<8xf32>
    %34 = vector.shape_cast %33 : vector<8xf32> to vector<8x1xf32>
    %c0_14 = arith.constant 0 : index
    %c0_15 = arith.constant 0 : index
    %35 = vector.load %arg5[%c0_14, %c0_15] : memref<8x1xf32, #tpu.memory_space<vmem>>, vector<8x1xf32>
    tpu.vector_store %arg5[%c0_14, %c0_15], %34 {strides = array<i32>} : memref<8x1xf32, #tpu.memory_space<vmem>>, vector<8x1xf32>,
    return
  }
  func.func @transform_0(%arg0: i32) -> (i32, i32) {
    %c0_i32 = arith.constant 0 : i32
    %c0_i32_0 = arith.constant 0 : i32
    %c0_i32_1 = arith.constant 0 : i32
    return %c0_i32, %c0_i32_0 : i32, i32
  }
  func.func @transform_1(%arg0: i32) -> (i32, i32) {
    %c0_i32 = arith.constant 0 : i32
    %c0_i32_0 = arith.constant 0 : i32
    %c0_i32_1 = arith.constant 0 : i32
    return %c0_i32, %c0_i32_0 : i32, i32
  }
  func.func @transform_2(%arg0: i32) -> (i32, i32) {
    %c0_i32 = arith.constant 0 : i32
    %c0_i32_0 = arith.constant 0 : i32
    %c0_i32_1 = arith.constant 0 : i32
    return %c0_i32, %c0_i32_0 : i32, i32
  }
  func.func @transform_3(%arg0: i32) -> (i32, i32) {
    %c0_i32 = arith.constant 0 : i32
    %c0_i32_0 = arith.constant 0 : i32
    %c0_i32_1 = arith.constant 0 : i32
    return %c0_i32, %c0_i32_0 : i32, i32
  }
  func.func @transform_4(%arg0: i32) -> (i32, i32) {
    %c0_i32 = arith.constant 0 : i32
    %c0_i32_0 = arith.constant 0 : i32
    return %arg0, %c0_i32 : i32, i32
  }
}

</mosaic_0001>

<bundles_post_ra>
// kernel: tpu_custom_call.1
= control target key start
LH: loop header
LB: loop body
LE: loop exit
PB: predicated region body
PF: predicated region fallthrough
CT: control target
= control target key end

     0   :  { %9 = vsyncpa [#allocation3], 0  ;;  %s1396_s0 = inlined_call_operand.hbm [shape: f32[16,32], index: 0, kind: input, shape index: {}]   ;;  %s1397_s1 = inlined_call_operand.hbm [shape: f32[16,10], index: 1, kind: input, shape index: {}]   ;;  %s1398_s2 = inlined_call_operand.hbm [shape: f32[1,16], index: 2, kind: input, shape index: {}]   ;;  %s1399_s3 = inlined_call_operand.hbm [shape: f32[1,16], index: 3, kind: input, shape index: {}]   ;;  %s1400_s4 = inlined_call_operand.hbm [shape: f32[16,1], index: 4, kind: output, shape index: {}]  }
   0x1   :  { %10 = vsyncpa [#allocation6], 0 }
   0x2   :  { %11 = vsyncpa [#allocation9], 0 }
   0x3   :  { %12 = vsyncpa [#allocation4], 0 }
   0x4   :  { %14 = vsyncpa [#allocation4 + $0x1], 0  ;;  %s1089_s15 = smov 0   ;;  %s1091_s16 = smov 0  }
   0x5   :  { %s1093_s17 = smov 0   ;;  %s1095_s18 = smov 0  }
   0x6 LB: > { %s1110_s19 = sadd.s32 4294967295, %s1051_s18   ;;  %s743_s20 = sadd.s32 4294967294, %s1051_s18   ;;  %s1051_s18 = sphi %s1095_s18, %s1421_s18   ;;  %s1047_s17 = sphi %s1093_s17, %s1420_s17   ;;  %s1043_s16 = sphi %s1091_s16, %s1419_s16   ;;  %s1039_s15 = sphi %s1089_s15, %s1418_s15  }
   0x7   : > { %s1114_s21 = sadd.s32 1, %s1051_s18   ;;  %s111_s22 = sadd.s32 1, %s1047_s17 }
   0x8   : > { %s108_s23 = ssub.s32 %s1051_s18, %s1114_s21  ;;  %p121_p0 = scmp.ne.s32.totalorder %s1047_s17, %s1043_s16 }
   0x9   : > { %p109_p1 = scmp.eq.s32.totalorder %s108_s23, 0  ;;  %p122_p2 = scmp.eq.s32.totalorder %s1110_s19, 1 }
   0xa   : > { %p127_p3 = scmp.ne.s32.totalorder %s1043_s16, %s1039_s15  ;;  %p128_p4 = scmp.eq.s32.totalorder %s743_s20, 1 }
   0xb   : > { %s1125_s24 = scalar_select %p109_p1, %s1047_s17, %s111_s22  }
   0xc   : > { %p1127_p5 = por %p122_p2, %p121_p0  ;;  %p1131_p6 = por %p128_p4, %p127_p3 }
   0xd   : > { %p744_p7 = scmp.ge.s32.totalorder %s1051_s18, 1  ;;  %p135_p8 = scmp.lt.s32.totalorder %s1051_s18, 3 }
   0xe   : > { %s1404_s25 = scalar_select %p1127_p5, 1, 0 }
   0xf   : > { %s1405_s26 = scalar_select %p1131_p6, 1, 0 }
  0x10   : > { %p1401_p9 = scmp.eq.s32.totalorder %s1110_s19, 0  ;;  %p1138_p10 = pnand %p744_p7, %p135_p8 }
  0x11   : > { %s1053_s28 = smov [#allocation5]   ;;  %s1054_s5 = smov [#allocation2]  }
  0x12   : > { %s1406_s27 = scalar_select %p1138_p10, 1, 0 }
  0x13   : > { %p796_p11 = pneg %p1138_p10  ;;  %s160_s29 = sshll.u32 %s1053_s28, 4  ;;  %s1144_s29 = int_to_ptr.vmem [resolvable:$true] %s160_s29 }
  0x14   : > { %s147_s6 = sshll.u32 %s1054_s5, 4  ;;  %s1055_s7 = smov [#allocation7]   ;;  %s1152_s6 = int_to_ptr.vmem [resolvable:$true] %s147_s6 }
  0x15   : > { %p1148_p12 = pnand %p1401_p9, %p796_p11  ;;  %s1154_s8 = sshll.u32 %s1055_s7, 4  ;;  %s175_s8 = int_to_ptr.vmem [resolvable:$true] %s1154_s8 }
  0x16   : > { %s865_s11 = scalar_lea.hbm %s1397_s1, 256 }
  0x17   : > { %p866_p13 = scmp.ne.s32.totalorder %s1397_s1, %s865_s11  ;;  %p1164_p0 = pneg %p1148_p12 }
  0x18   : > { %p872_p3 = scmp.lt.u32.totalorder %s865_s11, %s1397_s1 }
  0x19   : > { %p868_p1 = pnand %p1164_p0, %p866_p13 }
  0x1b   : > { %p869_p2 = pneg %p868_p1 }
  0x1d   : > { %p874_p4 = pnand %p872_p3, %p869_p2 }
  0x1f   : > { %877 = shalt.err (!%p874_p4)
}
  0x20   : > { %s878_s23 = scalar_lea.vmem %s1144_s29, 256  ;;  %p886_p9 = scmp.lt.s32.totalorder %s1144_s29, %s1144_s29 }
  0x21   : > { %p879_p7 = scmp.ne.s32.totalorder %s1144_s29, %s878_s23  ;;  %p887_p6 = scmp.lt.s32.totalorder %s878_s23, %s878_s23 }
  0x23   : > { %p881_p8 = pnand %p879_p7, %p1164_p0  ;;  %p888_p13 = por %p887_p6, %p886_p9 }
  0x25   : > { %p882_p11 = pneg %p881_p8 }
  0x27   : > { %p889_p1 = pnand %p888_p13, %p882_p11 }
  0x29   : > { %892 = shalt.err (!%p889_p1)
}
  0x2a   : > { %s1056_s28 = smov 128   ;;  %s1057_s5 = smov 8  }
  0x2b   : > { %802 = dma.hbm_to_vmem [thread:$0]  (!%p1148_p12), %s1397_s1, 256, %s1144_s29, [#allocation6], %s1056_s28, %s1056_s28, %s1057_s5  }
  0x2c   : > { %s893_s12 = scalar_lea.hbm %s1396_s0, 256 }
  0x2d   : > { %p894_p6 = scmp.ne.s32.totalorder %s1396_s0, %s893_s12  ;;  %p900_p3 = scmp.lt.u32.totalorder %s893_s12, %s1396_s0 }
  0x2f   : > { %p896_p9 = pnand %p894_p6, %p1164_p0 }
  0x31   : > { %p897_p2 = pneg %p896_p9 }
  0x33   : > { %p902_p4 = pnand %p900_p3, %p897_p2 }
  0x35   : > { %905 = shalt.err (!%p902_p4)
}
  0x36   : > { %s906_s29 = scalar_lea.vmem %s1152_s6, 256  ;;  %p914_p13 = scmp.lt.s32.totalorder %s1152_s6, %s1152_s6 }
  0x37   : > { %p907_p7 = scmp.ne.s32.totalorder %s1152_s6, %s906_s29  ;;  %p915_p1 = scmp.lt.s32.totalorder %s906_s29, %s906_s29 }
  0x39   : > { %p909_p8 = pnand %p907_p7, %p1164_p0  ;;  %p916_p6 = por %p915_p1, %p914_p13 }
  0x3b   : > { %p910_p11 = pneg %p909_p8 }
  0x3d   : > { %p917_p9 = pnand %p916_p6, %p910_p11 }
  0x3f   : > { %920 = shalt.err (!%p917_p9)
}
  0x40   : > { %799 = dma.hbm_to_vmem [thread:$0]  (!%p1148_p12), %s1396_s0, 256, %s1152_s6, [#allocation3], %s1056_s28, %s1056_s28, %s1057_s5  }
  0x41   : > { %s921_s12 = scalar_lea.hbm %s1398_s2, 16 }
  0x42   : > { %p922_p2 = scmp.ne.s32.totalorder %s1398_s2, %s921_s12  ;;  %p928_p7 = scmp.lt.u32.totalorder %s921_s12, %s1398_s2 }
  0x44   : > { %p924_p3 = pnand %p922_p2, %p1164_p0 }
  0x46   : > { %p925_p4 = pneg %p924_p3 }
  0x48   : > { %p930_p8 = pnand %p928_p7, %p925_p4 }
  0x4a   : > { %933 = shalt.err (!%p930_p8)
}
  0x4b   : > { %s934_s29 = scalar_lea.vmem %s175_s8, 16  ;;  %s941_s6 = scalar_lea.vmem %s175_s8, 32 }
  0x4c   : > { %p935_p11 = scmp.ne.s32.totalorder %s175_s8, %s934_s29  ;;  %p942_p6 = scmp.lt.s32.totalorder %s175_s8, %s175_s8 }
  0x4d   : > { %p943_p9 = scmp.lt.s32.totalorder %s941_s6, %s934_s29 }
  0x4e   : > { %p937_p13 = pnand %p935_p11, %p1164_p0 }
  0x4f   : > { %p944_p5 = por %p943_p9, %p942_p6 }
  0x50   : > { %p938_p1 = pneg %p937_p13 }
  0x52   : > { %p945_p10 = pnand %p944_p5, %p938_p1 }
  0x54   : > { %948 = shalt.err (!%p945_p10)
}
  0x55   : > { %805 = dma.hbm_to_vmem [thread:$0]  (!%p1148_p12), %s1398_s2, 16, %s175_s8, [#allocation6]  }
  0x56   : > { %s1058_s7 = smov [#allocation8]   ;;  %s949_s12 = scalar_lea.hbm %s1399_s3, 16 }
  0x57   : > { %s185_s9 = sshll.u32 %s1058_s7, 4  ;;  %p950_p2 = scmp.ne.s32.totalorder %s1399_s3, %s949_s12  ;;  %s186_s9 = int_to_ptr.vmem [resolvable:$true] %s185_s9 }
  0x58   : > { %p956_p3 = scmp.lt.u32.totalorder %s949_s12, %s1399_s3 }
  0x59   : > { %p952_p5 = pnand %p950_p2, %p1164_p0 }
  0x5b   : > { %p953_p10 = pneg %p952_p5 }
  0x5d   : > { %p958_p4 = pnand %p956_p3, %p953_p10 }
  0x5f   : > { %961 = shalt.err (!%p958_p4)
}
  0x60   : > { %s962_s8 = scalar_lea.vmem %s186_s9, 16  ;;  %s969_s29 = scalar_lea.vmem %s186_s9, 32 }
  0x61   : > { %p963_p7 = scmp.ne.s32.totalorder %s186_s9, %s962_s8  ;;  %p970_p13 = scmp.lt.s32.totalorder %s186_s9, %s186_s9 }
  0x62   : > { %p971_p1 = scmp.lt.s32.totalorder %s969_s29, %s962_s8 }
  0x63   : > { %p965_p8 = pnand %p963_p7, %p1164_p0 }
  0x64   : > { %p972_p6 = por %p971_p1, %p970_p13 }
  0x65   : > { %p966_p11 = pneg %p965_p8 }
  0x67   : > { %p973_p9 = pnand %p972_p6, %p966_p11 }
  0x69   : > { %976 = shalt.err (!%p973_p9)
}
  0x6a   : > { %808 = dma.hbm_to_vmem [thread:$0]  (!%p1148_p12), %s1399_s3, 16, %s186_s9, [#allocation9]  }
  0x6b   : > { %p1409_p2 = scmp.ne.s32.totalorder %s1406_s27, 0 }
  0x6c   : > { %p1410_p5 = scmp.eq.s32.totalorder (!%p1409_p2), %s1110_s19, 0 }
  0x6d   : > { %198 = sbr.rel (%p1409_p2) target bundleno = 514 (0x202), region = 36 }
  0x74   : > { %1022 = dma.done.wait (%p1410_p5), [#allocation3], 256   ;;  %p1411_p0 = pmov %p1410_p5 }
  0x76   : > { %1024 = vsyncadd (%p1411_p0), [#allocation3], 4294967040  ;;  %p1412_p10 = pmov %p1411_p0 }
  0x77   : > { %p1413_p3 = pmov %p1411_p0 }
  0x78   : > { %1026 = dma.done.wait (%p1412_p10), [#allocation6], 272  }
  0x79   : > { %1028 = vsyncadd (%p1413_p3), [#allocation6], 4294967024  ;;  %p1414_p4 = pmov %p1411_p0 }
  0x7a   : > { %p1415_p12 = pmov %p1411_p0 }
  0x7b   : > { %1030 = dma.done.wait (%p1414_p4), [#allocation9], 16  }
  0x7c   : > { %1032 = vsyncadd (%p1415_p12), [#allocation9], 4294967280  ;;  %v1059_v0 = vmov 0.0|0.0   ;;  %vm1060_vm0 = vmmov 0   ;;  %v1061_v1 = vmov 0.0   ;;  %v341_v2 = vlaneseq  ;;  %s755_s27 = sshll.u32 %s1110_s19, 3 }
  0x7d   : > { %774 = vmatprep.subr.bf16.mxu0 %v1059_v0  ;;  %771 = vmatprep.mubr.msk.f32.mxu0 %vm1060_vm0, %v1061_v1  ;;  %v1062_v3 = vmov 1966171168   ;;  %vm241_vm1 = vcmask 80896   ;;  %v238_v8 = vld [vmem:[#allocation5] sm:$0xff]  ;;  %v239_v9 = vld [vmem:[#allocation5 + $0x8] sm:$0xff]  ;;  %s232_s30 = scalar_lea.vmem [#allocation2], %s755_s27 }
  0x7e   : > { %v339_v4 = vunpack.c.l.s4 %v1062_v3  ;;  %v1261_v5 = vshrl.u32 %v341_v2, 7  ;;  %vm776_vm2 = vmpackc.low %vm241_vm1, %vm241_vm1  ;;  %v233_v10 = vld [vmem:[%s232_s30] sm:$0xff]  ;;  %v775_v11 = vpack.c.bf16 %v239_v9, %v238_v8  ;;  %s234_s14 = scalar_lea.vmem [#allocation5], %s755_s27  ;;  %v1272_v22 = vld [vmem:[#allocation2 + $0x8] sm:$0xff]  ;;  %vm458_vm3 = vcmask 261120   ;;  %s228_s5 = sand.u32 1, %s1043_s16  }
  0x7f   : > { %v235_v12 = vld [vmem:[%s234_s14] sm:$0xff]  ;;  %v337_v13 = vcombine.high %v233_v10, %v233_v10  ;;  %v540_v60 = vand.u32 127, %v341_v2  ;;  %vm550_vm4 = vcmask 130112   ;;  %vm615_vm5 = vcmask 1041409   ;;  %s754_s7 = sshll.u32 %s228_s5, 3  ;;  %s761_s9 = sshll.u32 %s1110_s19, 7 }
  0x80   : > { %v340_v6 = vunpack.c.0.s8 %v339_v4  ;;  %v1267_v15 = vsub.s32 0, %v1261_v5  ;;  %v240_v16 = vmul.f32 %v235_v12, %v235_v12  ;;  %777 = vmatpush3.bf16.xpose.msk.msra.mxu0 %vm776_vm2, %v775_v11  ;;  %v1270_v21 = vld [vmem:[#allocation2] sm:$0xff]  ;;  %vm617_vm6 = vcmask 1042434   ;;  %s230_s10 = scalar_lea.vmem [#allocation10], %s754_s7  ;;  %s1354_s20 = scalar_lea.hbm %s1400_s4, %s761_s9 }
  0x81   : > { %v1302_v3 = vsub.s32 %v540_v60, %v1261_v5  ;;  %vm619_vm7 = vcmask 1043459   ;;  %vm621_vm8 = vcmask 1044484   ;;  %vm623_vm9 = vcmask 1045509   ;;  %s651_s11 = sshll.u32 %s230_s10, 4  ;;  %s638_s22 = scalar_lea.sflag [#allocation4], %s228_s5  ;;  %s1356_s11 = int_to_ptr.vmem [resolvable:$true] %s651_s11 }
  0x82   : > { %v343_v7 = vsub.s32 %v340_v6, %v1261_v5  ;;  %v242_v20 = vsel %vm241_vm1, %v240_v16, 0.0  ;;  %vm625_vm10 = vcmask 1046534   ;;  %vm627_vm11 = vcmask 1047559   ;;  %s977_s23 = scalar_lea.vmem %s1356_s11, 128  ;;  %p1416_p8 = scmp.ne.s32.totalorder %s1404_s25, 0 }
  0x83   : > { %243 = vadd.xlane.f32.xlu0 %v242_v20  ;;  %vm631_vm12 = vcmask 130048   ;;  %vm635_vm13 = vcmask 7168   ;;  %p978_p7 = scmp.ne.s32.totalorder %s1356_s11, %s977_s23  ;;  %s1063_s19 = smov [#allocation10]  }
  0x84   : > { %v344_v14 = vrot.slane %v233_v10, %v343_v7  ;;  %v351_v19 = vrot.slane %v337_v13, %v343_v7  ;;  %s981_s8 = sshll.u32 %s1063_s19, 4  ;;  %s982_s8 = int_to_ptr.vmem [resolvable:$false] %s981_s8 }
  0x85   : > { %p979_p11 = pnand %p978_p7, %p1416_p8  ;;  %s983_s29 = scalar_lea.vmem %s982_s8, 256 }
  0x86   : > { %v360_v17 = vrot.slane %v344_v14, %v343_v7  ;;  %v352_v18 = vcombine.high %v344_v14, %v344_v14  ;;  %v367_v26 = vrot.slane %v351_v19, %v343_v7  ;;  %v353_v33 = vcombine.high %v351_v19, %v351_v19  ;;  %p984_p1 = scmp.lt.s32.totalorder %s1356_s11, %s982_s8  ;;  %p985_p6 = scmp.lt.s32.totalorder %s983_s29, %s977_s23 }
  0x87   : > { %772 = vmatmul.mubr.msk.f32.vlgmr.msra.gmra.mrb[0].mxu0 %vm241_vm1, %v235_v12  ;;  %p980_p13 = pneg %p979_p11 }
  0x88   : > { %v389_v23 = vrot.slane %v360_v17, %v1267_v15  ;;  %v374_v24 = vrot.slane %v352_v18, %v343_v7  ;;  %v382_v25 = vcombine.high %v360_v17, %v360_v17  ;;  %v405_v31 = vrot.slane %v367_v26, %v1267_v15  ;;  %p986_p9 = por %p985_p6, %p984_p1 }
  0x89   : > { %v381_v44 = vrot.slane %v353_v33, %v343_v7  ;;  %v383_v56 = vcombine.high %v367_v26, %v367_v26  ;;  %v545_v18 = vadd.s32 4294967288, %v540_v60 }
  0x8a   : > { %v426_v27 = vsub.f32 %v389_v23, %v1270_v21  ;;  %v393_v28 = vrot.slane %v374_v24, %v1267_v15  ;;  %v427_v29 = vsub.f32 %v389_v23, %v1272_v22  ;;  %v397_v30 = vrot.slane %v382_v25, %v1267_v15  ;;  %p987_p2 = pnand %p986_p9, %p980_p13 }
  0x8b   : > { %v384_v32 = vcombine.high %v374_v24, %v374_v24  ;;  %v434_v43 = vsub.f32 %v405_v31, %v1270_v21  ;;  %v435_v51 = vsub.f32 %v405_v31, %v1272_v22  ;;  %v409_v53 = vrot.slane %v381_v44, %v1267_v15 }
  0x8c   : > { %v442_v34 = vand.u32 2147483647, %v426_v27  ;;  %v428_v35 = vsub.f32 %v393_v28, %v1270_v21  ;;  %v443_v36 = vand.u32 2147483647, %v427_v29  ;;  %v429_v37 = vsub.f32 %v393_v28, %v1272_v22 }
  0x8d   : > { %v430_v38 = vsub.f32 %v397_v30, %v1270_v21  ;;  %v431_v42 = vsub.f32 %v397_v30, %v1272_v22  ;;  %v401_v48 = vrot.slane %v384_v32, %v1267_v15  ;;  %v450_v52 = vand.u32 2147483647, %v434_v43 }
  0x8e   : > { %v459_v39 = vsel %vm458_vm3, %v442_v34, 0.0  ;;  %v444_v40 = vand.u32 2147483647, %v428_v35  ;;  %v445_v41 = vand.u32 2147483647, %v429_v37  ;;  %v462_v46 = vsel %vm458_vm3, %v443_v36, 0.0 }
  0x8f   : > { %460 = vadd.xlane.f32.xlu0 %v459_v39  ;;  %v446_v47 = vand.u32 2147483647, %v430_v38  ;;  %v447_v50 = vand.u32 2147483647, %v431_v42  ;;  %v432_v55 = vsub.f32 %v401_v48, %v1270_v21  ;;  %v451_v58 = vand.u32 2147483647, %v435_v51 }
  0x90   : > { %v465_v45 = vsel %vm458_vm3, %v444_v40, 0.0  ;;  %v468_v49 = vsel %vm458_vm3, %v445_v41, 0.0  ;;  %v433_v59 = vsub.f32 %v401_v48, %v1272_v22  ;;  %v483_v61 = vsel %vm458_vm3, %v450_v52, 0.0 }
  0x91   : > { %466 = vadd.xlane.f32.xlu1 %v465_v45  ;;  %v471_v54 = vsel %vm458_vm3, %v446_v47, 0.0  ;;  %v474_v57 = vsel %vm458_vm3, %v447_v50, 0.0  ;;  %v437_v62 = vsub.f32 %v409_v53, %v1272_v22  ;;  %v448_v63 = vand.u32 2147483647, %v432_v55 }
  0x92   : > { %v413_v0 = vrot.slane %v383_v56, %v1267_v15  ;;  %v385_v1 = vcombine.high %v381_v44, %v381_v44  ;;  %v486_v4 = vsel %vm458_vm3, %v451_v58, 0.0  ;;  %v449_v6 = vand.u32 2147483647, %v433_v59 }
  0x93   : > { %463 = vadd.xlane.f32.xlu0 %v462_v46  ;;  %v436_v7 = vsub.f32 %v409_v53, %v1270_v21  ;;  %v477_v2 = vsel %vm458_vm3, %v448_v63, 0.0  ;;  %v453_v8 = vand.u32 2147483647, %v437_v62 }
  0x94   : > { %v439_v9 = vsub.f32 %v413_v0, %v1272_v22  ;;  %v417_v10 = vrot.slane %v385_v1, %v1267_v15  ;;  %v480_v11 = vsel %vm458_vm3, %v449_v6, 0.0  ;;  %v438_v13 = vsub.f32 %v413_v0, %v1270_v21 }
  0x95   : > { %469 = vadd.xlane.f32.xlu1 %v468_v49  ;;  %v452_v12 = vand.u32 2147483647, %v436_v7  ;;  %v492_v14 = vsel %vm458_vm3, %v453_v8, 0.0  ;;  %v1316_v15 = vsub.s32 %v545_v18, %v1261_v5 }
  0x96   : > { %v455_v16 = vand.u32 2147483647, %v439_v9  ;;  %v441_v17 = vsub.f32 %v417_v10, %v1272_v22  ;;  %v454_v20 = vand.u32 2147483647, %v438_v13  ;;  %v440_v23 = vsub.f32 %v417_v10, %v1270_v21 }
  0x97   : > { %472 = vadd.xlane.f32.xlu0 %v471_v54  ;;  %v489_v19 = vsel %vm458_vm3, %v452_v12, 0.0 }
  0x98   : > { %v498_v24 = vsel %vm458_vm3, %v455_v16, 0.0  ;;  %v457_v25 = vand.u32 2147483647, %v441_v17  ;;  %v495_v26 = vsel %vm458_vm3, %v454_v20, 0.0  ;;  %v456_v27 = vand.u32 2147483647, %v440_v23 }
  0x99   : > { %475 = vadd.xlane.f32.xlu1 %v474_v57 }
  0x9a   : > { %v504_v22 = vsel %vm458_vm3, %v457_v25, 0.0  ;;  %v501_v28 = vsel %vm458_vm3, %v456_v27, 0.0 }
  0x9b   : > { %484 = vadd.xlane.f32.xlu0 %v483_v61 }
  0x9d   : > { %487 = vadd.xlane.f32.xlu1 %v486_v4 }
  0x9f   : > { %478 = vadd.xlane.f32.xlu0 %v477_v2 }
  0xa1   : > { %481 = vadd.xlane.f32.xlu1 %v480_v11 }
  0xa3   : > { %493 = vadd.xlane.f32.xlu0 %v492_v14 }
  0xa5   : > { %490 = vadd.xlane.f32.xlu1 %v489_v19 }
  0xa7   : > { %499 = vadd.xlane.f32.xlu0 %v498_v24 }
  0xa9   : > { %496 = vadd.xlane.f32.xlu1 %v495_v26 }
  0xab   : > { %505 = vadd.xlane.f32.xlu0 %v504_v22 }
  0xad   : > { %502 = vadd.xlane.f32.xlu1 %v501_v28 }
 0x110   : > { %v1322_v21 = vpop.xlane.xlu0 %243 }
 0x11c   : > { %v461_v29 = vpop.xlane.xlu0 %460 }
 0x11d   : > { %v507_v5 = vmul.f32 0.03125, %v461_v29 }
 0x11e   : > { %v467_v30 = vpop.xlane.xlu1 %466 }
 0x11f   : > { %v509_v31 = vmul.f32 0.03125, %v467_v30  ;;  %v544_v33 = vrot.slane %v507_v5, %v1302_v3  ;;  %v759_v30 = vld [vmem:[#allocation8] ss:$0 sm:$0xff] }
 0x120   : > { %v464_v32 = vpop.xlane.xlu0 %463 }
 0x121   : > { %v508_v34 = vmul.f32 0.03125, %v464_v32  ;;  %v555_v36 = vrot.slane %v509_v31, %v1302_v3  ;;  %v331_v32 = vadd.f32 %v759_v30, %v1322_v21 }
 0x122   : > { %v470_v35 = vpop.xlane.xlu1 %469 }
 0x123   : > { %v549_v37 = vrot.slane %v508_v34, %v1316_v15  ;;  %v510_v38 = vmul.f32 0.03125, %v470_v35 }
 0x124   : > { %v473_v39 = vpop.xlane.xlu0 %472 }
 0x125   : > { %v551_v40 = vsel %vm550_vm4, %v549_v37, %v544_v33  ;;  %v559_v41 = vrot.slane %v510_v38, %v1316_v15  ;;  %v511_v42 = vmul.f32 0.03125, %v473_v39 }
 0x126   : > { %v476_v43 = vpop.xlane.xlu1 %475 }
 0x127   : > { %v560_v44 = vsel %vm550_vm4, %v559_v41, %v555_v36  ;;  %v564_v45 = vrot.slane %v511_v42, %v1302_v3  ;;  %v512_v46 = vmul.f32 0.03125, %v476_v43 }
 0x128   : > { %v616_v47 = vsel %vm615_vm5, %v560_v44, %v551_v40  ;;  %v485_v48 = vpop.xlane.xlu0 %484 }
 0x129   : > { %v568_v49 = vrot.slane %v512_v46, %v1316_v15  ;;  %v515_v50 = vmul.f32 0.03125, %v485_v48 }
 0x12a   : > { %v488_v51 = vpop.xlane.xlu1 %487 }
 0x12b   : > { %v569_v52 = vsel %vm550_vm4, %v568_v49, %v564_v45  ;;  %v516_v53 = vmul.f32 0.03125, %v488_v51  ;;  %v582_v54 = vrot.slane %v515_v50, %v1302_v3 }
 0x12c   : > { %v618_v55 = vsel %vm617_vm6, %v569_v52, %v616_v47  ;;  %v479_v56 = vpop.xlane.xlu0 %478 }
 0x12d   : > { %v586_v57 = vrot.slane %v516_v53, %v1316_v15  ;;  %v513_v58 = vmul.f32 0.03125, %v479_v56 }
 0x12e   : > { %v482_v59 = vpop.xlane.xlu1 %481 }
 0x12f   : > { %v587_v60 = vsel %vm550_vm4, %v586_v57, %v582_v54  ;;  %v514_v61 = vmul.f32 0.03125, %v482_v59  ;;  %v573_v62 = vrot.slane %v513_v58, %v1302_v3 }
 0x130   : > { %v494_v63 = vpop.xlane.xlu0 %493 }
 0x131   : > { %v577_v0 = vrot.slane %v514_v61, %v1316_v15  ;;  %v518_v1 = vmul.f32 0.03125, %v494_v63 }
 0x132   : > { %v491_v4 = vpop.xlane.xlu1 %490 }
 0x133   : > { %v578_v6 = vsel %vm550_vm4, %v577_v0, %v573_v62  ;;  %v595_v7 = vrot.slane %v518_v1, %v1316_v15  ;;  %v517_v2 = vmul.f32 0.03125, %v491_v4 }
 0x134   : > { %v620_v8 = vsel %vm619_vm7, %v578_v6, %v618_v55  ;;  %v500_v9 = vpop.xlane.xlu0 %499 }
 0x135   : > { %v591_v10 = vrot.slane %v517_v2, %v1302_v3  ;;  %v520_v11 = vmul.f32 0.03125, %v500_v9  ;;  %v622_v12 = vsel %vm621_vm8, %v587_v60, %v620_v8 }
 0x136   : > { %v497_v13 = vpop.xlane.xlu1 %496 }
 0x137   : > { %v596_v14 = vsel %vm550_vm4, %v595_v7, %v591_v10  ;;  %v604_v16 = vrot.slane %v520_v11, %v1316_v15  ;;  %v519_v17 = vmul.f32 0.03125, %v497_v13 }
 0x138   : > { %v506_v18 = vpop.xlane.xlu0 %505  ;;  %v624_v19 = vsel %vm623_vm9, %v596_v14, %v622_v12 }
 0x139   : > { %v600_v20 = vrot.slane %v519_v17, %v1302_v3  ;;  %v522_v23 = vmul.f32 0.03125, %v506_v18 }
 0x13a   : > { %v503_v24 = vpop.xlane.xlu1 %502 }
 0x13b   : > { %v605_v25 = vsel %vm550_vm4, %v604_v16, %v600_v20  ;;  %v613_v26 = vrot.slane %v522_v23, %v1316_v15  ;;  %v521_v27 = vmul.f32 0.03125, %v503_v24 }
 0x13c   : > { %v626_v22 = vsel %vm625_vm10, %v605_v25, %v624_v19 }
 0x13d   : > { %v609_v28 = vrot.slane %v521_v27, %v1302_v3 }
 0x13f   : > { %v614_v29 = vsel %vm550_vm4, %v613_v26, %v609_v28 }
 0x140   : > { %v628_v5 = vsel %vm627_vm11, %v614_v29, %v626_v22 }
 0x15a   : > { %v320_v31 = vpop.f32.mrb[0].mxu0 }
 0x15b   : > { %v332_v33 = vmul.f32 2.0, %v320_v31  ;;  %v773_v34 = vpop.f32.mrb[1].mxu0 }
 0x15d   : > { %v333_v35 = vsub.f32 %v331_v32, %v332_v33 }
 0x15f   : > { %v334_v36 = vmax.f32 %v333_v35, 0.0 }
 0x161   : > { %v335_v37 = vmul.f32 0.1, %v334_v36 }
 0x163   : > { %v630_v15 = vmul.f32 %v628_v5, %v335_v37 }
 0x165   : > { %v632_v38 = vsel %vm631_vm12, %v630_v15, 0.0 }
 0x166   : > { %633 = vadd.xlane.f32.xlu1 %v632_v38 }
 0x1f3   : > { %v634_v3 = vpop.xlane.xlu1 %633 }
 0x1f4   : > { %636 = vst.msk [vmem:[%s230_s10] sm:$0xff] %vm635_vm13, %v634_v3 }
 0x1f5   : > { %990 = shalt.err (!%p987_p2)
}
 0x1f6   : > { %s991_s6 = scalar_lea.hbm %s1354_s20, 128  ;;  %s995_s30 = scalar_lea.hbm %s1400_s4, 256 }
 0x1f7   : > { %p992_p5 = scmp.ne.s32.totalorder %s1354_s20, %s991_s6  ;;  %p996_p3 = scmp.lt.u32.totalorder %s1354_s20, %s1400_s4 }
 0x1f8   : > { %p997_p4 = scmp.lt.u32.totalorder %s995_s30, %s991_s6  ;;  %p999_p7 = scmp.lt.u32.totalorder %s991_s6, %s1354_s20 }
 0x1f9   : > { %p993_p0 = pnand %p992_p5, %p1416_p8 }
 0x1fa   : > { %p998_p12 = por %p997_p4, %p996_p3 }
 0x1fb   : > { %p994_p10 = pneg %p993_p0 }
 0x1fc   : > { %p1000_p11 = por %p999_p7, %p998_p12 }
 0x1fe   : > { %p1001_p13 = pnand %p1000_p11, %p994_p10 }
 0x200   : > { %1004 = shalt.err (!%p1001_p13)
}
 0x201   : > { %794 = dma.vmem_to_hbm [thread:$0]  (%p1416_p8), %s1356_s11, 128, %s1354_s20, %s638_s22  }
 0x202 PF: > { %p821_p1 = scmp.ge.s32.totalorder %s1051_s18, 2  ;;  %s663_s7 = sand.u32 1, %s1039_s15  }
 0x203   : > { %p1417_p6 = scmp.ne.s32.totalorder %s1405_s26, 0  ;;  %s664_s9 = scalar_lea.sflag [#allocation4], %s663_s7 }
 0x205   : > { %p810_p9 = pnand %p821_p1, %p1417_p6 }
 0x207   : > { %1034 = dma.done.wait (!%p810_p9), %s664_s9, 128  }
 0x208   : > { %1036 = vsyncadd (!%p810_p9), %s664_s9, 4294967168  ;;  %p17_p2 = scmp.ge.s32.totalorder %s1114_s21, 4   ;;  %s1418_s15 = smov %s1043_s16 }
 0x209   : > { %s1419_s16 = smov %s1047_s17  ;;  %s1420_s17 = smov %s1125_s24 }
 0x20a   : > { %s1421_s18 = smov %s1114_s21  ;;  %19 = sbr.rel (!%p17_p2) target bundleno = 6 (0x6), region = 87 }
 0x211   :  { %669 = vsyncpa [#allocation3], 1 }
 0x212   :  { %671 = vsyncpa [#allocation3 + $0x1], 1 }
 0x213   :  { %672 = vsyncpa [#allocation6], 1 }
 0x214   :  { %673 = vsyncpa [#allocation9], 1 }
 0x215   :  { %674 = vsyncpa [#allocation4], 1 }
 0x216   :  { %676 = vsyncpa [#allocation4 + $0x1], 1 }

</bundles_post_ra>
